<compile_context>
chip_gen: v5e
topology: v5e:2x2
jax: 0.10.0
libtpu: 0.0.40
codegen_flags: <defaults>
</compile_context>

<pallas_src>
import math
import numpy as np
import jax
import jax.numpy as jnp
from jax.experimental import pallas as pl
from jax.experimental.pallas import tpu as pltpu

# ----------------------- config (small synthetic sizes) -----------------------
HIDDEN = 32                 # config.hidden_size == config.encoder_hidden_size
NUM_HEADS = 4               # config.num_attention_heads
HEAD_DIM = HIDDEN // NUM_HEADS
NUM_QUERIES = 8             # config.num_learnable_queries
GRID_SIZE = 4               # config.grid_size
KV_LEN = NUM_QUERIES + GRID_SIZE * GRID_SIZE + 1   # q + 2d grid + cls
BATCH = 2


# --------------------- sincos positional embeddings (numpy) -------------------
def get_1d_sincos_pos_embed_from_grid(embed_dim, pos):
    assert embed_dim % 2 == 0
    omega = np.arange(embed_dim // 2, dtype=np.float64)
    omega /= embed_dim / 2.0
    omega = 1.0 / 10000 ** omega
    pos = pos.reshape(-1)
    out = np.einsum("m,d->md", pos, omega)
    return np.concatenate([np.sin(out), np.cos(out)], axis=1)


def get_2d_sincos_pos_embed(embed_dim, grid_size, cls_token=False):
    grid_h = np.arange(grid_size, dtype=np.float32)
    grid_w = np.arange(grid_size, dtype=np.float32)
    grid = np.meshgrid(grid_w, grid_h)
    grid = np.stack(grid, axis=0).reshape([2, 1, grid_size, grid_size])
    emb_h = get_1d_sincos_pos_embed_from_grid(embed_dim // 2, grid[0])
    emb_w = get_1d_sincos_pos_embed_from_grid(embed_dim // 2, grid[1])
    pos_embed = np.concatenate([emb_h, emb_w], axis=1)
    if cls_token:
        pos_embed = np.concatenate([np.zeros([1, embed_dim]), pos_embed], axis=0)
    return pos_embed


# -------------------- one-time parameter folding (off call path) --------------------
def prepare_visual_mha(params, batch):
    """Fold weights/biases/pos-embeds once; returns tensors the wrapper reuses."""
    wq, bq, wk, bk, wv, bv = (params[n] for n in ("wq", "bq", "wk", "bk", "wv", "bv"))
    qpos, kpos = params["q_pos_embed"], params["k_pos_embed"]
    H = wq.shape[0]
    nh = NUM_HEADS
    dh = H // nh
    scale = 1.0 / math.sqrt(dh)
    Lq = qpos.shape[0]
    qkpos = jnp.concatenate([qpos, kpos], axis=0)                        # (Lk, H)
    Lk = qkpos.shape[0]

    # Fused weights: [Wq^T*scale | Wk^T | Wv^T] (PyTorch Linear W is (out,in)).
    w_fused = jnp.concatenate([wq.T * scale, wk.T, wv.T], axis=1)        # (H, 3H)

    # Positional embeds + biases folded (exact by linearity) into per-row bias
    # rows; columns a row block does not consume are zero (outputs discarded).
    q_bias = (qpos @ wq.T + bq) * scale                                  # (Lq, H)
    k_bias = qkpos @ wk.T + bk                                           # (Lk, H)
    v_bias = jnp.broadcast_to(bv[None, :], (Lk, H))                      # (Lk, H)
    top = jnp.concatenate([q_bias, jnp.zeros((Lq, 2 * H), jnp.float32)], axis=1)
    bot = jnp.concatenate([jnp.zeros((Lk, H), jnp.float32), k_bias, v_bias], axis=1)
    b_fused = jnp.concatenate([jnp.tile(top, (batch, 1)),
                               jnp.tile(bot, (batch, 1))], axis=0)       # (M, 3H)

    # Single operand: weights stacked on top of the folded bias rows.
    wb = jnp.concatenate([w_fused, b_fused], axis=0)                     # (H+M, 3H)
    return {"wb": jax.device_put(wb), "num_heads": nh}


# --------------------------------- wrapper -------------------------------------
def visual_multi_head_attention(hidden_states, encoder_hidden_states, folded):
    """Returns (context_layer, (key_layer, value_layer)) like the PyTorch module
    with output_attentions=False, attention_mask=None, head_mask=None."""
    B, Lq, H = hidden_states.shape
    Lk = encoder_hidden_states.shape[1]
    nh = folded["num_heads"]
    dh = H // nh
    BLq, BLk = B * Lq, B * Lk
    M = BLq + BLk
    wb = folded["wb"]
    assert wb.shape == (H + M, 3 * H)

    # Guard the one-MXU-tile assumption behind the head/batch block-diagonal
    # formulation (128 = smallest MXU tile across v5e/v6e/v7x).  Beyond this,
    # move batch (and/or heads) to a grid axis instead of growing the matmuls.
    assert nh * BLq <= 128 and BLk <= 128 and M <= 128 and 3 * H <= 128

    def kernel(hs_ref, enc_ref, wb_ref, ctx_ref, kv_ref, x_scr):
        # Stack [hidden_states; encoder_hidden_states] in VMEM so ALL three
        # projections run as ONE matmul.
        x_scr[pl.ds(0, BLq), :] = hs_ref[...]
        x_scr[pl.ds(BLq, BLk), :] = enc_ref[...]

        w = wb_ref[pl.ds(0, H), :]            # [Wq^T*scale | Wk^T | Wv^T]  (H, 3H)
        b = wb_ref[pl.ds(H, M), :]            # folded positional + bias rows (M, 3H)
        proj = jnp.dot(x_scr[...], w, preferred_element_type=jnp.float32) + b

        q = proj[:BLq, :H]                    # (B*Lq, H), scale already folded in
        kv = proj[BLq:, H:]                   # (B*Lk, 2H) = past_key_value
        kv_ref[...] = kv                      # one dense store
        # TODO(synk): per perf review, check MLIR for XLU relayouts on these
        # lane-offset slices; harmless at this size (XLU slack).
        k = kv[:, :H]
        v = kv[:, H:]

        # Head column selector (nh, 1, H), generated in-kernel (VPU slack).
        lane = jax.lax.broadcasted_iota(jnp.int32, (nh, 1, H), 2)
        head = jax.lax.broadcasted_iota(jnp.int32, (nh, 1, H), 0)
        hmask = ((lane >= head * dh) & (lane < (head + 1) * dh)).astype(jnp.float32)

        # Head-block-diagonal Q: all heads AND batches share ONE score matmul
        # and ONE PV matmul.  Row order of q_exp is (head, batch, query).
        q_exp = (q[None, :, :] * hmask).reshape(nh * BLq, H)
        s = jax.lax.dot_general(q_exp, k, (((1,), (1,)), ((), ())),
                                preferred_element_type=jnp.float32)      # (nh*BLq, BLk)

        # Cross-batch mask generated in-kernel.  The row batch id comes straight
        # from a 4-D iota (no integer division); the column check is an interval
        # test.  Mask + softmax stay in f32 (keeps -1e30 representable).
        bid = jax.lax.broadcasted_iota(
            jnp.int32, (nh, B, Lq, BLk), 1).reshape(nh * BLq, BLk)
        col = jax.lax.broadcasted_iota(jnp.int32, (nh * BLq, BLk), 1)
        in_batch = (col >= bid * Lk) & (col < (bid + 1) * Lk)
        s = jnp.where(in_batch, s, -1e30)

        s = s - jnp.max(s, axis=-1, keepdims=True)
        p = jnp.exp(s)
        p = p * pl.reciprocal(jnp.sum(p, axis=-1, keepdims=True), approx=True)
        # TODO(synk): attention-probs dropout is identity in eval mode; not modeled.

        c_full = jnp.dot(p, v, preferred_element_type=jnp.float32)       # (nh*BLq, H)
        # Each head's own column block sits in its own row block; select with the
        # head mask and sum over heads to assemble (B*Lq, H) in one dense store.
        ctx_ref[...] = jnp.sum(c_full.reshape(nh, BLq, H) * hmask, axis=0)

    full2d = lambda i: (0, 0)
    ctx2d, kv2d = pl.pallas_call(
        kernel,
        out_shape=(
            jax.ShapeDtypeStruct((BLq, H), jnp.float32),
            jax.ShapeDtypeStruct((BLk, 2 * H), jnp.float32),
        ),
        grid=(1,),
        in_specs=[
            pl.BlockSpec((BLq, H), full2d),          # hidden_states (flattened)
            pl.BlockSpec((BLk, H), full2d),          # encoder_hidden_states
            pl.BlockSpec((H + M, 3 * H), full2d),    # stacked weights + folded biases
        ],
        out_specs=(
            pl.BlockSpec((BLq, H), full2d),          # context
            pl.BlockSpec((BLk, 2 * H), full2d),      # past_key_value [k | v]
        ),
        scratch_shapes=[pltpu.VMEM((M, H), jnp.float32)],
        compiler_params=pltpu.CompilerParams(dimension_semantics=("arbitrary",)),
    )(hidden_states.reshape(BLq, H), encoder_hidden_states.reshape(BLk, H), wb)

    # transpose_for_scores equivalent (pure reshape/transpose glue).
    ctx = ctx2d.reshape(B, Lq, H)
    kv3 = kv2d.reshape(B, Lk, 2 * H)
    key_layer = kv3[..., :H].reshape(B, Lk, nh, dh).transpose(0, 2, 1, 3)
    value_layer = kv3[..., H:].reshape(B, Lk, nh, dh).transpose(0, 2, 1, 3)
    return ctx, (key_layer, value_layer)


# ------------------------------ pure-JAX reference ------------------------------
def reference(hidden_states, encoder_hidden_states, params):
    wq, bq, wk, bk, wv, bv = (params[n] for n in ("wq", "bq", "wk", "bk", "wv", "bv"))
    qpos, kpos = params["q_pos_embed"], params["k_pos_embed"]
    qkpos = jnp.concatenate([qpos, kpos], axis=0)[None]

    def split(x):
        B, L, _ = x.shape
        return x.reshape(B, L, NUM_HEADS, HEAD_DIM).transpose(0, 2, 1, 3)

    k = split((encoder_hidden_states + qkpos) @ wk.T + bk)
    v = split(encoder_hidden_states @ wv.T + bv)
    q = split((hidden_states + qpos[None]) @ wq.T + bq)
    s = jnp.einsum("bhqd,bhkd->bhqk", q, k) / math.sqrt(HEAD_DIM)
    p = jax.nn.softmax(s, axis=-1)
    ctx = jnp.einsum("bhqk,bhkd->bhqd", p, v)
    B, Lq = hidden_states.shape[:2]
    ctx = ctx.transpose(0, 2, 1, 3).reshape(B, Lq, HIDDEN)
    return ctx, (k, v)


# ------------------------------------ main --------------------------------------
if __name__ == "__main__":
    key = jax.random.PRNGKey(0)
    k_hs, k_enc, kq, kk, kv, kbq, kbk, kbv = jax.random.split(key, 8)

    hidden_states = jax.random.normal(k_hs, (BATCH, NUM_QUERIES, HIDDEN), jnp.float32)
    encoder_hidden_states = jax.random.normal(k_enc, (BATCH, KV_LEN, HIDDEN), jnp.float32)

    bound = 1.0 / math.sqrt(HIDDEN)
    params = {
        "wq": jax.random.uniform(kq, (HIDDEN, HIDDEN), jnp.float32, -bound, bound),
        "wk": jax.random.uniform(kk, (HIDDEN, HIDDEN), jnp.float32, -bound, bound),
        "wv": jax.random.uniform(kv, (HIDDEN, HIDDEN), jnp.float32, -bound, bound),
        "bq": jax.random.uniform(kbq, (HIDDEN,), jnp.float32, -bound, bound),
        "bk": jax.random.uniform(kbk, (HIDDEN,), jnp.float32, -bound, bound),
        "bv": jax.random.uniform(kbv, (HIDDEN,), jnp.float32, -bound, bound),
        "q_pos_embed": jnp.asarray(
            get_1d_sincos_pos_embed_from_grid(
                HIDDEN, np.arange(NUM_QUERIES, dtype=np.float32)), jnp.float32),
        "k_pos_embed": jnp.asarray(
            get_2d_sincos_pos_embed(HIDDEN, GRID_SIZE, cls_token=True), jnp.float32),
    }

    # One-time folding, hoisted off the per-call path.
    folded = prepare_visual_mha(params, BATCH)
    jax.block_until_ready(folded["wb"])

    ctx, (k_layer, v_layer) = visual_multi_head_attention(
        hidden_states, encoder_hidden_states, folded)
    jax.block_until_ready((ctx, k_layer, v_layer))

    ctx_ref, (k_ref, v_ref) = reference(hidden_states, encoder_hidden_states, params)
    # ctx tolerance relaxed for the EUP approx reciprocal in the softmax
    # denominator (~1e-4-level relative error); k/v relaxed slightly for the
    # bias/pos-embed fold reassociation (both sanctioned by the perf review).
    np.testing.assert_allclose(np.asarray(ctx), np.asarray(ctx_ref), rtol=2e-3, atol=2e-3)
    np.testing.assert_allclose(np.asarray(k_layer), np.asarray(k_ref), rtol=1e-4, atol=1e-4)
    np.testing.assert_allclose(np.asarray(v_layer), np.asarray(v_ref), rtol=1e-4, atol=1e-4)

    print("KERNEL_OK")
</pallas_src>

<mosaic_0001>
module attributes {stable_mosaic.version = 11 : i64} {
  func.func @kernel(%arg0: i32, %arg1: memref<16x32xf32, #tpu.memory_space<vmem>>, %arg2: memref<50x32xf32, #tpu.memory_space<vmem>>, %arg3: memref<98x96xf32, #tpu.memory_space<vmem>>, %arg4: memref<16x32xf32, #tpu.memory_space<vmem>>, %arg5: memref<50x64xf32, #tpu.memory_space<vmem>>, %arg6: memref<66x32xf32, #tpu.memory_space<vmem>>) attributes {dimension_semantics = [#tpu.dimension_semantics<arbitrary>], iteration_bounds = array<i64: 1>, scalar_prefetch = 0 : i64, scratch_operands = 1 : i64, tpu.core_type = #tpu.core_type<tc>, window_params = [{pipeline_mode = #tpu.pipeline_mode<synchronous>, transform_indices = @transform_0, window_bounds = array<i64: 16, 32>}, {pipeline_mode = #tpu.pipeline_mode<synchronous>, transform_indices = @transform_1, window_bounds = array<i64: 50, 32>}, {pipeline_mode = #tpu.pipeline_mode<synchronous>, transform_indices = @transform_2, window_bounds = array<i64: 98, 96>}, {pipeline_mode = #tpu.pipeline_mode<synchronous>, transform_indices = @transform_3, window_bounds = array<i64: 16, 32>}, {pipeline_mode = #tpu.pipeline_mode<synchronous>, transform_indices = @transform_4, window_bounds = array<i64: 50, 64>}]} {
    %c0 = arith.constant 0 : index
    %c0_0 = arith.constant 0 : index
    %0 = vector.load %arg1[%c0, %c0_0] : memref<16x32xf32, #tpu.memory_space<vmem>>, vector<16x32xf32>
    %c0_1 = arith.constant 0 : index
    %c0_2 = arith.constant 0 : index
    %1 = vector.load %arg6[%c0_1, %c0_2] : memref<66x32xf32, #tpu.memory_space<vmem>>, vector<16x32xf32>
    tpu.vector_store %arg6[%c0_1, %c0_2], %0 {strides = array<i32>} : memref<66x32xf32, #tpu.memory_space<vmem>>, vector<16x32xf32>,
    %c0_3 = arith.constant 0 : index
    %c0_4 = arith.constant 0 : index
    %2 = vector.load %arg2[%c0_3, %c0_4] : memref<50x32xf32, #tpu.memory_space<vmem>>, vector<50x32xf32>
    %c16 = arith.constant 16 : index
    %c0_5 = arith.constant 0 : index
    %3 = vector.load %arg6[%c16, %c0_5] : memref<66x32xf32, #tpu.memory_space<vmem>>, vector<50x32xf32>
    tpu.vector_store %arg6[%c16, %c0_5], %2 {strides = array<i32>} : memref<66x32xf32, #tpu.memory_space<vmem>>, vector<50x32xf32>,
    %c0_6 = arith.constant 0 : index
    %c0_7 = arith.constant 0 : index
    %4 = vector.load %arg3[%c0_6, %c0_7] : memref<98x96xf32, #tpu.memory_space<vmem>>, vector<32x96xf32>
    %c32 = arith.constant 32 : index
    %c0_8 = arith.constant 0 : index
    %5 = vector.load %arg3[%c32, %c0_8] : memref<98x96xf32, #tpu.memory_space<vmem>>, vector<66x96xf32>
    %c0_9 = arith.constant 0 : index
    %c0_10 = arith.constant 0 : index
    %6 = vector.load %arg6[%c0_9, %c0_10] : memref<66x32xf32, #tpu.memory_space<vmem>>, vector<66x32xf32>
    %cst = arith.constant dense<0.000000e+00> : vector<66x96xf32>
    %7 = tpu.matmul %6, %4, %cst {dimension_numbers = #tpu.dot_dimension_numbers<[1], [0], [0], [1], [0, 0, 1, 1], [], []>} : vector<66x32xf32>, vector<32x96xf32>, vector<66x96xf32> -> vector<66x96xf32>
    %8 = arith.addf %7, %5 : vector<66x96xf32>
    %9 = vector.extract_strided_slice %8 {offsets = [0, 0], sizes = [16, 32], strides = [1, 1]} : vector<66x96xf32> to vector<16x32xf32>
    %10 = vector.extract_strided_slice %8 {offsets = [16, 32], sizes = [50, 64], strides = [1, 1]} : vector<66x96xf32> to vector<50x64xf32>
    %c0_11 = arith.constant 0 : index
    %c0_12 = arith.constant 0 : index
    %11 = vector.load %arg5[%c0_11, %c0_12] : memref<50x64xf32, #tpu.memory_space<vmem>>, vector<50x64xf32>
    tpu.vector_store %arg5[%c0_11, %c0_12], %10 {strides = array<i32>} : memref<50x64xf32, #tpu.memory_space<vmem>>, vector<50x64xf32>,
    %12 = vector.extract_strided_slice %10 {offsets = [0, 0], sizes = [50, 32], strides = [1, 1]} : vector<50x64xf32> to vector<50x32xf32>
    %13 = vector.extract_strided_slice %10 {offsets = [0, 32], sizes = [50, 32], strides = [1, 1]} : vector<50x64xf32> to vector<50x32xf32>
    %14 = tpu.iota {dimensions = array<i32: 2>} : vector<4x1x32xi32>
    %15 = tpu.iota {dimensions = array<i32: 0>} : vector<4x1x32xi32>
    %c8_i32 = arith.constant 8 : i32
    %16 = vector.broadcast %c8_i32 : i32 to vector<4x1x32xi32>
    %17 = arith.muli %15, %16 : vector<4x1x32xi32>
    %18 = arith.cmpi sge, %14, %17 : vector<4x1x32xi32>
    %c1_i32 = arith.constant 1 : i32
    %19 = vector.broadcast %c1_i32 : i32 to vector<4x1x32xi32>
    %20 = arith.addi %15, %19 : vector<4x1x32xi32>
    %c8_i32_13 = arith.constant 8 : i32
    %21 = vector.broadcast %c8_i32_13 : i32 to vector<4x1x32xi32>
    %22 = arith.muli %20, %21 : vector<4x1x32xi32>
    %23 = arith.cmpi slt, %14, %22 : vector<4x1x32xi32>
    %24 = arith.andi %18, %23 : vector<4x1x32xi1>
    %25 = arith.extui %24 : vector<4x1x32xi1> to vector<4x1x32xi32>
    %26 = arith.sitofp %25 : vector<4x1x32xi32> to vector<4x1x32xf32>
    %27 = vector.shape_cast %9 : vector<16x32xf32> to vector<1x16x32xf32>
    %28 = vector.broadcast %27 : vector<1x16x32xf32> to vector<4x16x32xf32>
    %29 = vector.broadcast %26 : vector<4x1x32xf32> to vector<4x16x32xf32>
    %30 = arith.mulf %28, %29 : vector<4x16x32xf32>
    %31 = vector.shape_cast %30 : vector<4x16x32xf32> to vector<64x32xf32>
    %cst_14 = arith.constant dense<0.000000e+00> : vector<64x50xf32>
    %32 = tpu.matmul %31, %12, %cst_14 {dimension_numbers = #tpu.dot_dimension_numbers<[1], [1], [0], [0], [0, 0, 1, 0], [], []>} : vector<64x32xf32>, vector<50x32xf32>, vector<64x50xf32> -> vector<64x50xf32>
    %33 = tpu.iota {dimensions = array<i32: 1>} : vector<4x2x8x50xi32>
    %34 = vector.shape_cast %33 : vector<4x2x8x50xi32> to vector<64x50xi32>
    %35 = tpu.iota {dimensions = array<i32: 1>} : vector<64x50xi32>
    %c25_i32 = arith.constant 25 : i32
    %36 = vector.broadcast %c25_i32 : i32 to vector<64x50xi32>
    %37 = arith.muli %34, %36 : vector<64x50xi32>
    %38 = arith.cmpi sge, %35, %37 : vector<64x50xi32>
    %c1_i32_15 = arith.constant 1 : i32
    %39 = vector.broadcast %c1_i32_15 : i32 to vector<64x50xi32>
    %40 = arith.addi %34, %39 : vector<64x50xi32>
    %c25_i32_16 = arith.constant 25 : i32
    %41 = vector.broadcast %c25_i32_16 : i32 to vector<64x50xi32>
    %42 = arith.muli %40, %41 : vector<64x50xi32>
    %43 = arith.cmpi slt, %35, %42 : vector<64x50xi32>
    %44 = arith.andi %38, %43 : vector<64x50xi1>
    %cst_17 = arith.constant -1.000000e+30 : f32
    %45 = vector.broadcast %cst_17 : f32 to vector<64x50xf32>
    %46 = arith.select %44, %32, %45 : vector<64x50xi1>, vector<64x50xf32>
    %cst_18 = arith.constant dense<0xFF800000> : vector<64xf32>
    %47 = vector.multi_reduction <maximumf>, %46, %cst_18 [1] : vector<64x50xf32> to vector<64xf32>
    %48 = vector.shape_cast %47 : vector<64xf32> to vector<64x1xf32>
    %49 = vector.broadcast %48 : vector<64x1xf32> to vector<64x50xf32>
    %50 = arith.subf %46, %49 : vector<64x50xf32>
    %51 = math.exp %50 : vector<64x50xf32>
    %cst_19 = arith.constant dense<0.000000e+00> : vector<64xf32>
    %52 = vector.multi_reduction <add>, %51, %cst_19 [1] : vector<64x50xf32> to vector<64xf32>
    %53 = vector.shape_cast %52 : vector<64xf32> to vector<64x1xf32>
    %54 = tpu.reciprocal %53 {approx = true} : vector<64x1xf32> -> vector<64x1xf32>
    %55 = vector.broadcast %54 : vector<64x1xf32> to vector<64x50xf32>
    %56 = arith.mulf %51, %55 : vector<64x50xf32>
    %cst_20 = arith.constant dense<0.000000e+00> : vector<64x32xf32>
    %57 = tpu.matmul %56, %13, %cst_20 {dimension_numbers = #tpu.dot_dimension_numbers<[1], [0], [0], [1], [0, 0, 1, 1], [], []>} : vector<64x50xf32>, vector<50x32xf32>, vector<64x32xf32> -> vector<64x32xf32>
    %58 = vector.shape_cast %57 : vector<64x32xf32> to vector<4x16x32xf32>
    %59 = vector.broadcast %26 : vector<4x1x32xf32> to vector<4x16x32xf32>
    %60 = arith.mulf %58, %59 : vector<4x16x32xf32>
    %cst_21 = arith.constant dense<0.000000e+00> : vector<16x32xf32>
    %61 = vector.multi_reduction <add>, %60, %cst_21 [0] : vector<4x16x32xf32> to vector<16x32xf32>
    %c0_22 = arith.constant 0 : index
    %c0_23 = arith.constant 0 : index
    %62 = vector.load %arg4[%c0_22, %c0_23] : memref<16x32xf32, #tpu.memory_space<vmem>>, vector<16x32xf32>
    tpu.vector_store %arg4[%c0_22, %c0_23], %61 {strides = array<i32>} : memref<16x32xf32, #tpu.memory_space<vmem>>, vector<16x32xf32>,
    return
  }
  func.func @transform_0(%arg0: i32) -> (i32, i32) {
    %c0_i32 = arith.constant 0 : i32
    %c0_i32_0 = arith.constant 0 : i32
    %c0_i32_1 = arith.constant 0 : i32
    return %c0_i32, %c0_i32_0 : i32, i32
  }
  func.func @transform_1(%arg0: i32) -> (i32, i32) {
    %c0_i32 = arith.constant 0 : i32
    %c0_i32_0 = arith.constant 0 : i32
    %c0_i32_1 = arith.constant 0 : i32
    return %c0_i32, %c0_i32_0 : i32, i32
  }
  func.func @transform_2(%arg0: i32) -> (i32, i32) {
    %c0_i32 = arith.constant 0 : i32
    %c0_i32_0 = arith.constant 0 : i32
    %c0_i32_1 = arith.constant 0 : i32
    return %c0_i32, %c0_i32_0 : i32, i32
  }
  func.func @transform_3(%arg0: i32) -> (i32, i32) {
    %c0_i32 = arith.constant 0 : i32
    %c0_i32_0 = arith.constant 0 : i32
    %c0_i32_1 = arith.constant 0 : i32
    return %c0_i32, %c0_i32_0 : i32, i32
  }
  func.func @transform_4(%arg0: i32) -> (i32, i32) {
    %c0_i32 = arith.constant 0 : i32
    %c0_i32_0 = arith.constant 0 : i32
    %c0_i32_1 = arith.constant 0 : i32
    return %c0_i32, %c0_i32_0 : i32, i32
  }
}

</mosaic_0001>

<bundles_post_ra>
// kernel: tpu_custom_call.1
= control target key start
LH: loop header
LB: loop body
LE: loop exit
PB: predicated region body
PF: predicated region fallthrough
CT: control target
= control target key end

     0   :  { %10 = vsyncpa [#allocation4], 0  ;;  %vm20_vm0 = vcmask 261120   ;;  %s989_s0 = inlined_call_operand.vmem [shape: f32[16,32], index: 0, kind: input, shape index: {}]   ;;  %s990_s1 = inlined_call_operand.vmem [shape: f32[50,32], index: 1, kind: input, shape index: {}]   ;;  %s991_s2 = inlined_call_operand.vmem [shape: f32[98,96], index: 2, kind: input, shape index: {}]   ;;  %s992_s3 = inlined_call_operand.hbm [shape: f32[16,32], index: 3, kind: output, shape index: {0}]   ;;  %s993_s4 = inlined_call_operand.hbm [shape: f32[50,64], index: 4, kind: output, shape index: {1}]  }
   0x1   :  { %v41_v0 = vld [vmem:[%s991_s2 + $0x18] sm:$0xff]  ;;  %v40_v1 = vld [vmem:[%s991_s2 + $0x10] sm:$0xff]  ;;  %v18_v2 = vld [vmem:[%s989_s0] sm:$0xff] }
   0x2   :  { %99 = vmatpush.msra.mxu0 %v41_v0  ;;  %v19_v3 = vld [vmem:[%s989_s0 + $0x8] sm:$0xff]  ;;  %21 = vst.msk [vmem:[#allocation2] sm:$0xff] %vm20_vm0, %v18_v2  ;;  %v23_v5 = vld [vmem:[%s990_s1] sm:$0xff]  ;;  %v25_v7 = vld [vmem:[%s990_s1 + $0x10] sm:$0xff] }
   0x3   :  { %v39_v4 = vld [vmem:[%s991_s2 + $0x8] sm:$0xff]  ;;  %22 = vst.msk [vmem:[#allocation2 + $0x8] sm:$0xff] %vm20_vm0, %v19_v3 }
   0x4   :  { %v24_v6 = vld [vmem:[%s990_s1 + $0x8] sm:$0xff]  ;;  %100 = vmatpush.msra.mxu0 %v40_v1 }
   0x5   :  { %11 = vsyncpa [#allocation6], 0  ;;  %v38_v8 = vld [vmem:[%s991_s2] sm:$0xff]  ;;  %30 = vst.msk [vmem:[#allocation2 + $0x10] sm:$0xff] %vm20_vm0, %v23_v5  ;;  %v26_v10 = vld [vmem:[%s990_s1 + $0x18] sm:$0xff]  ;;  %vm36_vm1 = vcmask 254976   ;;  %v168_v54 = vlaneseq }
   0x6   :  { %101 = vmatpush.msra.mxu0 %v39_v4  ;;  %31 = vst.msk [vmem:[#allocation2 + $0x18] sm:$0xff] %vm20_vm0, %v24_v6  ;;  %v27_v12 = vld [vmem:[%s990_s1 + $0x20] sm:$0xff]  ;;  %v28_v14 = vld [vmem:[%s990_s1 + $0x28] sm:$0xff]  ;;  %v29_v16 = vld [vmem:[%s990_s1 + $0x30] sm:$0x3]  ;;  %s677_s19 = smov 96  }
   0x7   :  { %32 = vst.msk [vmem:[#allocation2 + $0x20] sm:$0xff] %vm20_vm0, %v25_v7  ;;  %v44_v25 = vld [vmem:[%s991_s2 + $0x30] sm:$0xff]  ;;  %v45_v26 = vld [vmem:[%s991_s2 + $0x38] sm:$0xff]  ;;  %v46_v31 = vld [vmem:[%s991_s2 + $0x40] sm:$0xff]  ;;  %vm159_vm2 = vcmask 523264   ;;  %vm166_vm3 = vcmask 517120  }
   0x8   :  { %102 = vmatpush.msra.mxu0 %v38_v8  ;;  %33 = vst.msk [vmem:[#allocation2 + $0x28] sm:$0xff] %vm20_vm0, %v26_v10  ;;  %v47_v34 = vld [vmem:[%s991_s2 + $0x48] sm:$0xff]  ;;  %v48_v38 = vld [vmem:[%s991_s2 + $0x50] sm:$0xff]  ;;  %v49_v41 = vld [vmem:[%s991_s2 + $0x58] sm:$0xff]  ;;  %v831_v56 = vand.u32 127, %v168_v54  ;;  %v678_v59 = vmov 0.0  }
   0x9   :  { %v51_v9 = vld [vmem:[#allocation2] sm:$0xff]  ;;  %34 = vst.msk [vmem:[#allocation2 + $0x30] sm:$0xff] %vm20_vm0, %v27_v12  ;;  %v43_v0 = vld [vmem:[%s991_s2 + $0x28] sm:$0xff]  ;;  %vm290_vm15 = vcmask 408576   ;;  %s680_s5 = smov [#allocation5]   ;;  %s510_s9 = sshll.u32 %s993_s4, 4  ;;  %s511_s9 = int_to_ptr.hbm [resolvable:$true] %s510_s9 }
   0xa   :  { %527 = vmatmul.msk.f32.vlgmr.msra.gmra.mxu0 %vm20_vm0, %v51_v9  ;;  %v52_v11 = vld [vmem:[#allocation2 + $0x8] sm:$0xff]  ;;  %35 = vst.msk [vmem:[#allocation2 + $0x38] sm:$0xff] %vm20_vm0, %v28_v14  ;;  %v50_v45 = vld [vmem:[%s991_s2 + $0x60] sm:$0x3]  ;;  %vm173_vm4 = vcmp.ge.s32.totalorder %v831_v56, 24  ;;  %vm177_vm5 = vcmp.lt.s32.totalorder %v831_v56, 32 }
   0xb   :  { %37 = vst.msk [vmem:[#allocation2 + $0x40] sm:$0x3] %vm36_vm1, %v29_v16  ;;  %v42_v57 = vld [vmem:[%s991_s2 + $0x20] sm:$0xff]  ;;  %vm174_vm6 = vcmp.lt.s32.totalorder %v831_v56, 8  ;;  %vm181_vm7 = vmand %vm173_vm4, %vm177_vm5  ;;  %vm171_vm8 = vcmp.ge.s32.totalorder %v831_v56, 8  ;;  %vm175_vm9 = vcmp.lt.s32.totalorder %v831_v56, 16 }
   0xc   :  { %v53_v13 = vld [vmem:[#allocation2 + $0x10] sm:$0xff]  ;;  %v844_v60 = vsel %vm174_vm6, 1.0, %v678_v59  ;;  %v846_v61 = vsel %vm181_vm7, 1.0, %v678_v59  ;;  %vm179_vm10 = vmand %vm171_vm8, %vm175_vm9  ;;  %vm172_vm11 = vcmp.ge.s32.totalorder %v831_v56, 16  ;;  %vm176_vm12 = vcmp.lt.s32.totalorder %v831_v56, 24  ;;  %s679_s2 = smov 64  }
   0xd   :  { %v54_v15 = vld [vmem:[#allocation2 + $0x18] sm:$0xff]  ;;  %v864_v4 = vsel %vm179_vm10, 1.0, %v678_v59  ;;  %vm180_vm13 = vmand %vm172_vm11, %vm176_vm12  ;;  %vm278_vm14 = vcmp.lt.s32.totalorder %v831_v56, 25  ;;  %vm277_vm1 = vcmp.ge.s32.totalorder %v831_v56, 25  ;;  %vm423_vm4 = vcmask 1041408   ;;  %s508_s6 = sshll.u32 %s680_s5, 4  ;;  %s509_s6 = int_to_ptr.vmem [resolvable:$true] %s508_s6 }
   0xe   :  { %v55_v17 = vld [vmem:[#allocation2 + $0x20] sm:$0xff]  ;;  %v872_v7 = vsel %vm180_vm13, 1.0, %v678_v59  ;;  %s681_s10 = smov 128   ;;  %s682_s11 = smov 8  }
   0xf   :  { %v56_v18 = vld [vmem:[#allocation2 + $0x28] sm:$0xff]  ;;  %s683_s4 = smov [#allocation3]   ;;  %s497_s14 = sshll.u32 %s992_s3, 4  ;;  %s498_s14 = int_to_ptr.hbm [resolvable:$true] %s497_s14 }
  0x10   :  { %v57_v19 = vld [vmem:[#allocation2 + $0x30] sm:$0xff]  ;;  %s495_s12 = sshll.u32 %s683_s4, 4  ;;  %s496_s12 = int_to_ptr.vmem [resolvable:$true] %s495_s12 }
  0x11   :  { %v58_v20 = vld [vmem:[#allocation2 + $0x38] sm:$0xff] }
  0x12   :  { %528 = vmatmul.msk.f32.gmra.mxu0 %vm20_vm0, %v52_v11  ;;  %v59_v21 = vld [vmem:[#allocation2 + $0x40] sm:$0x3] }
  0x1a   :  { %529 = vmatmul.msk.f32.gmra.mxu0 %vm20_vm0, %v53_v13 }
  0x22   :  { %530 = vmatmul.msk.f32.gmra.mxu0 %vm20_vm0, %v54_v15 }
  0x2a   :  { %531 = vmatmul.msk.f32.gmra.mxu0 %vm20_vm0, %v55_v17 }
  0x32   :  { %532 = vmatmul.msk.f32.gmra.mxu0 %vm20_vm0, %v56_v18 }
  0x3a   :  { %533 = vmatmul.msk.f32.gmra.mxu0 %vm20_vm0, %v57_v19 }
  0x42   :  { %534 = vmatmul.msk.f32.gmra.mxu0 %vm20_vm0, %v58_v20 }
  0x4a   :  { %535 = vmatmul.msk.f32.gmra.mxu0 %vm20_vm0, %v59_v21 }
  0x87   :  { %v765_v22 = vpop.f32.mrf.mxu0 }
  0x88   :  { %v105_v58 = vadd.f32 %v765_v22, %v42_v57 }
  0x8a   :  { %v190_v62 = vmul.f32 %v844_v60, %v105_v58  ;;  %v196_v63 = vmul.f32 %v846_v61, %v105_v58  ;;  %v192_v5 = vmul.f32 %v864_v4, %v105_v58  ;;  %v194_v8 = vmul.f32 %v872_v7, %v105_v58 }
  0x8f   :  { %v767_v23 = vpop.f32.mrf.mxu0 }
  0x90   :  { %v108_v1 = vadd.f32 %v767_v23, %v43_v0 }
  0x92   :  { %v191_v2 = vmul.f32 %v844_v60, %v108_v1  ;;  %v197_v3 = vmul.f32 %v846_v61, %v108_v1  ;;  %v193_v6 = vmul.f32 %v864_v4, %v108_v1  ;;  %v195_v9 = vmul.f32 %v872_v7, %v108_v1 }
  0x97   :  { %v110_v24 = vpop.f32.mrf.mxu0 }
  0x98   :  { %v775_v28 = vadd.f32 %v110_v24, %v44_v25 }
  0x9f   :  { %v113_v27 = vpop.f32.mrf.mxu0 }
  0xa0   :  { %v777_v29 = vadd.f32 %v113_v27, %v45_v26 }
  0xa2   :  { %v588_v30 = vpack.i.bf16 %v775_v28, %v777_v29 }
  0xa7   :  { %v116_v32 = vpop.f32.mrf.mxu0 }
  0xa8   :  { %v784_v33 = vadd.f32 %v116_v32, %v46_v31 }
  0xaa   :  { %142 = vrot.lane.b32.xlu2 %v784_v33, %s677_s19 }
  0xaf   :  { %v119_v35 = vpop.f32.mrf.mxu0 }
  0xb0   :  { %v790_v36 = vadd.f32 %v119_v35, %v47_v34 }
  0xb2   :  { %v583_v37 = vpack.i.bf16 %v784_v33, %v790_v36  ;;  %140 = vrot.lane.b32.xlu2 %v777_v29, %s677_s19 }
  0xb7   :  { %v122_v39 = vpop.f32.mrf.mxu0 }
  0xb8   :  { %v798_v40 = vadd.f32 %v122_v39, %v48_v38 }
  0xba   :  { %146 = vrot.lane.b32.xlu1 %v798_v40, %s677_s19 }
  0xbf   :  { %v125_v42 = vpop.f32.mrf.mxu0 }
  0xc0   :  { %v804_v43 = vadd.f32 %v125_v42, %v49_v41 }
  0xc2   :  { %v578_v44 = vpack.i.bf16 %v798_v40, %v804_v43  ;;  %144 = vrot.lane.b32.xlu1 %v790_v36, %s677_s19 }
  0xc7   :  { %v128_v46 = vpop.f32.mrf.mxu0 }
  0xc8   :  { %v812_v47 = vadd.f32 %v128_v46, %v50_v45 }
  0xca   :  { %150 = vrot.lane.b32.xlu0 %v812_v47, %s677_s19 }
  0xd2   :  { %148 = vrot.lane.b32.xlu0 %v804_v43, %s677_s19 }
  0xda   :  { %138 = vrot.lane.b32.xlu0 %v775_v28, %s677_s19 }
 0x104   :  { %v143_v48 = vpop.permute.xlu2 %142 }
 0x105   :  { %162 = vst.msk [vmem:[#allocation5 + $0x10] sm:$0xff] %vm159_vm2, %v143_v48 }
 0x10c   :  { %v141_v49 = vpop.permute.xlu2 %140 }
 0x10d   :  { %161 = vst.msk [vmem:[#allocation5 + $0x8] sm:$0xff] %vm159_vm2, %v141_v49 }
 0x12c   :  { %v147_v50 = vpop.permute.xlu1 %146 }
 0x12d   :  { %164 = vst.msk [vmem:[#allocation5 + $0x20] sm:$0xff] %vm159_vm2, %v147_v50 }
 0x134   :  { %v145_v51 = vpop.permute.xlu1 %144 }
 0x135   :  { %163 = vst.msk [vmem:[#allocation5 + $0x18] sm:$0xff] %vm159_vm2, %v145_v51 }
 0x13c   :  { %v151_v52 = vpop.permute.xlu0 %150 }
 0x13d   :  { %167 = vst.msk [vmem:[#allocation5 + $0x30] sm:$0x3] %vm166_vm3, %v151_v52  ;;  %540 = vmatpush.xpose.msk.msra.mxu1 %vm20_vm0, %v151_v52  ;;  %564 = vmatpush.xpose.msk.msra.mxu3 %vm20_vm0, %v151_v52 }
 0x144   :  { %v149_v53 = vpop.permute.xlu0 %148 }
 0x145   :  { %165 = vst.msk [vmem:[#allocation5 + $0x28] sm:$0xff] %vm159_vm2, %v149_v53  ;;  %541 = vmatpush.xpose.msk.msra.mxu1 %vm20_vm0, %v149_v53  ;;  %565 = vmatpush.xpose.msk.msra.mxu3 %vm20_vm0, %v149_v53 }
 0x149   :  { %542 = vmatpush.xpose.msk.msra.mxu1 %vm20_vm0, %v147_v50  ;;  %566 = vmatpush.xpose.msk.msra.mxu3 %vm20_vm0, %v147_v50 }
 0x14c   :  { %v139_v55 = vpop.permute.xlu0 %138 }
 0x14d   :  { %160 = vst.msk [vmem:[#allocation5] sm:$0xff] %vm159_vm2, %v139_v55  ;;  %543 = vmatpush.xpose.msk.msra.mxu1 %vm20_vm0, %v145_v51  ;;  %567 = vmatpush.xpose.msk.msra.mxu3 %vm20_vm0, %v145_v51  ;;  %vm279_vm2 = vcmp.lt.s32.totalorder %v831_v56, 50 }
 0x14e   :  { %vm884_vm3 = vmand %vm277_vm1, %vm279_vm2  ;;  %516 = dma.vmem_to_hbm [thread:$0]  %s509_s6, 896, %s511_s9, [#allocation6], %s681_s10, %s681_s10, %s682_s11  }
 0x151   :  { %544 = vmatpush.xpose.msk.msra.mxu1 %vm20_vm0, %v143_v48  ;;  %568 = vmatpush.xpose.msk.msra.mxu3 %vm20_vm0, %v143_v48 }
 0x155   :  { %545 = vmatpush.xpose.msk.msra.mxu1 %vm20_vm0, %v141_v49  ;;  %569 = vmatpush.xpose.msk.msra.mxu3 %vm20_vm0, %v141_v49 }
 0x159   :  { %546 = vmatpush.xpose.msk.msra.mxu1 %vm20_vm0, %v139_v55  ;;  %570 = vmatpush.xpose.msk.msra.mxu3 %vm20_vm0, %v139_v55 }
 0x15c   :  { %547 = vmatmul.msk.f32.vlgmr.msra.gmra.mxu1 %vm20_vm0, %v190_v62  ;;  %553 = vmatmul.msk.f32.vlgmr.msra.gmra.mxu3 %vm20_vm0, %v196_v63 }
 0x164   :  { %548 = vmatmul.msk.f32.gmra.mxu1 %vm20_vm0, %v191_v2  ;;  %554 = vmatmul.msk.f32.gmra.mxu3 %vm20_vm0, %v197_v3 }
 0x16c   :  { %549 = vmatmul.msk.f32.gmra.mxu1 %vm20_vm0, %v192_v5 }
 0x174   :  { %550 = vmatmul.msk.f32.gmra.mxu1 %vm20_vm0, %v193_v6 }
 0x17c   :  { %551 = vmatmul.msk.f32.gmra.mxu1 %vm20_vm0, %v194_v8 }
 0x184   :  { %552 = vmatmul.msk.f32.gmra.mxu1 %vm20_vm0, %v195_v9 }
 0x1d9   :  { %v253_v10 = vpop.f32.mrf.mxu1 }
 0x1da   :  { %v282_v11 = vsel %vm278_vm14, %v253_v10, -1e+30 }
 0x1db   :  { %v291_v12 = vsel %vm290_vm15, %v282_v11, -inf }
 0x1dc   :  { %292 = vmax.xlane.f32.xlu1 %v291_v12 }
 0x1df   :  { %v271_v13 = vpop.f32.mrf.mxu3 }
 0x1e0   :  { %v288_v15 = vsel %vm278_vm14, %v271_v13, -1e+30 }
 0x1e1   :  { %v256_v16 = vpop.f32.mrf.mxu1  ;;  %v309_v17 = vsel %vm290_vm15, %v288_v15, -inf }
 0x1e2   :  { %v283_v18 = vsel %vm884_vm3, %v256_v16, -1e+30  ;;  %310 = vmax.xlane.f32.xlu0 %v309_v17 }
 0x1e3   :  { %v294_v19 = vsel %vm290_vm15, %v283_v18, -inf }
 0x1e4   :  { %295 = vmax.xlane.f32.xlu2 %v294_v19 }
 0x1e7   :  { %v274_v38 = vpop.f32.mrf.mxu3 }
 0x1e8   :  { %v918_v33 = vsel %vm884_vm3, %v274_v38, -1e+30 }
 0x1e9   :  { %v259_v20 = vpop.f32.mrf.mxu1  ;;  %v312_v36 = vsel %vm290_vm15, %v918_v33, -inf }
 0x1ea   :  { %v284_v21 = vsel %vm278_vm14, %v259_v20, -1e+30 }
 0x1eb   :  { %v297_v22 = vsel %vm290_vm15, %v284_v21, -inf }
 0x1ec   :  { %298 = vmax.xlane.f32.xlu0 %v297_v22 }
 0x1f1   :  { %v262_v23 = vpop.f32.mrf.mxu1 }
 0x1f2   :  { %v285_v24 = vsel %vm884_vm3, %v262_v23, -1e+30 }
 0x1f3   :  { %v300_v25 = vsel %vm290_vm15, %v285_v24, -inf }
 0x1f4   :  { %301 = vmax.xlane.f32.xlu2 %v300_v25 }
 0x1f9   :  { %v265_v26 = vpop.f32.mrf.mxu1 }
 0x1fa   :  { %v286_v27 = vsel %vm278_vm14, %v265_v26, -1e+30 }
 0x1fb   :  { %v303_v31 = vsel %vm290_vm15, %v286_v27, -inf }
 0x1fc   :  { %304 = vmax.xlane.f32.xlu1 %v303_v31 }
 0x200   :  { %584 = vrot.lane.b32.xlu0 %v583_v37, %s679_s2 }
 0x201   :  { %v268_v32 = vpop.f32.mrf.mxu1 }
 0x202   :  { %v912_v34 = vsel %vm884_vm3, %v268_v32, -1e+30 }
 0x203   :  { %v306_v35 = vsel %vm290_vm15, %v912_v34, -inf }
 0x20c   :  { %579 = vrot.lane.b32.xlu2 %v578_v44, %s679_s2 }
 0x215   :  { %391 = vrot.lane.b32.xlu1 %v812_v47, %s679_s2 }
 0x235   :  { %307 = vmax.xlane.f32.xlu2 %v306_v35 }
 0x23f   :  { %313 = vmax.xlane.f32.xlu1 %v312_v36 }
 0x24d   :  { %589 = vrot.lane.b32.xlu2 %v588_v30, %s679_s2 }
 0x24f   :  { %v293_v37 = vpop.xlane.xlu1 %292 }
 0x250   :  { %v315_v39 = vsub.f32 %v282_v11, %v293_v37 }
 0x252   :  { %v323_v40 = vmul.f32 1.442695, %v315_v39 }
 0x254   :  { %593 = vpow2.f32 %v323_v40 }
 0x255   :  { %v311_v42 = vpop.xlane.xlu0 %310 }
 0x256   :  { %v321_v52 = vsub.f32 %v288_v15, %v311_v42 }
 0x257   :  { %v296_v41 = vpop.xlane.xlu2 %295 }
 0x258   :  { %v316_v43 = vsub.f32 %v283_v18, %v296_v41  ;;  %v335_v53 = vmul.f32 1.442695, %v321_v52 }
 0x25a   :  { %v925_v44 = vpop.eup %593  ;;  %v325_v45 = vmul.f32 1.442695, %v316_v43 }
 0x25b   :  { %v339_v46 = vsel %vm290_vm15, %v925_v44, 0.0 }
 0x25c   :  { %595 = vpow2.f32 %v325_v45  ;;  %340 = vadd.xlane.f32.xlu0 %v339_v46 }
 0x25f   :  { %v299_v47 = vpop.xlane.xlu0 %298 }
 0x260   :  { %v317_v28 = vsub.f32 %v284_v21, %v299_v47 }
 0x262   :  { %v929_v48 = vpop.eup %595  ;;  %v327_v30 = vmul.f32 1.442695, %v317_v28 }
 0x263   :  { %v342_v29 = vsel %vm290_vm15, %v929_v48, 0.0 }
 0x264   :  { %343 = vadd.xlane.f32.xlu0 %v342_v29  ;;  %597 = vpow2.f32 %v327_v30 }
 0x267   :  { %v302_v49 = vpop.xlane.xlu2 %301 }
 0x268   :  { %v318_v50 = vsub.f32 %v285_v24, %v302_v49 }
 0x26a   :  { %v329_v51 = vmul.f32 1.442695, %v318_v50  ;;  %v598_v56 = vpop.eup %597 }
 0x26b   :  { %v345_v62 = vsel %vm290_vm15, %v598_v56, 0.0 }
 0x26c   :  { %599 = vpow2.f32 %v329_v51 }
 0x26d   :  { %601 = vpow2.f32 %v335_v53 }
 0x26f   :  { %v305_v54 = vpop.xlane.xlu1 %304  ;;  %v580_v3 = vpop.permute.xlu2 %579 }
 0x270   :  { %v319_v55 = vsub.f32 %v286_v27, %v305_v54  ;;  %v581_v6 = vunpack.i.l.bf16 %v580_v3  ;;  %v582_v9 = vunpack.i.h.bf16 %v580_v3 }
 0x272   :  { %v933_v57 = vpop.eup %599  ;;  %v331_v58 = vmul.f32 1.442695, %v319_v55  ;;  %v585_v8 = vpop.permute.xlu0 %584 }
 0x273   :  { %v348_v59 = vsel %vm290_vm15, %v933_v57, 0.0  ;;  %v938_v63 = vpop.eup %601  ;;  %v586_v10 = vunpack.i.l.bf16 %v585_v8  ;;  %v587_v11 = vunpack.i.h.bf16 %v585_v8 }
 0x274   :  { %603 = vpow2.f32 %v331_v58  ;;  %349 = vadd.xlane.f32.xlu1 %v348_v59  ;;  %v357_v2 = vsel %vm290_vm15, %v938_v63, 0.0 }
 0x276   :  { %346 = vadd.xlane.f32.xlu2 %v345_v62 }
 0x27a   :  { %v604_v0 = vpop.eup %603 }
 0x27b   :  { %v351_v1 = vsel %vm290_vm15, %v604_v0, 0.0 }
 0x27c   :  { %352 = vadd.xlane.f32.xlu1 %v351_v1 }
 0x27e   :  { %358 = vadd.xlane.f32.xlu2 %v357_v2 }
 0x287   :  { %v392_v5 = vpop.permute.xlu1 %391 }
 0x288   :  { %555 = vmatpush.msk.msra.mxu2 %vm423_vm4, %v392_v5 }
 0x28a   :  { %436 = vmatpush.msra.mxu2 %v581_v6 }
 0x28c   :  { %437 = vmatpush.msra.mxu2 %v582_v9 }
 0x28e   :  { %438 = vmatpush.msra.mxu2 %v586_v10 }
 0x290   :  { %439 = vmatpush.msra.mxu2 %v587_v11 }
 0x2a8   :  { %v308_v12 = vpop.xlane.xlu2 %307 }
 0x2a9   :  { %v320_v13 = vsub.f32 %v912_v34, %v308_v12 }
 0x2ab   :  { %v333_v14 = vmul.f32 1.442695, %v320_v13 }
 0x2ad   :  { %605 = vpow2.f32 %v333_v14 }
 0x2b0   :  { %v590_v15 = vpop.permute.xlu2 %589 }
 0x2b1   :  { %v591_v16 = vunpack.i.l.bf16 %v590_v15  ;;  %v592_v20 = vunpack.i.h.bf16 %v590_v15 }
 0x2b2   :  { %v314_v17 = vpop.xlane.xlu1 %313 }
 0x2b3   :  { %v606_v18 = vpop.eup %605  ;;  %v322_v19 = vsub.f32 %v918_v33, %v314_v17  ;;  %440 = vmatpush.msra.mxu2 %v591_v16 }
 0x2b4   :  { %v354_v21 = vsel %vm290_vm15, %v606_v18, 0.0 }
 0x2b5   :  { %v337_v22 = vmul.f32 1.442695, %v322_v19  ;;  %355 = vadd.xlane.f32.xlu0 %v354_v21  ;;  %441 = vmatpush.msra.mxu2 %v592_v20 }
 0x2b7   :  { %607 = vpow2.f32 %v337_v22 }
 0x2bd   :  { %v608_v23 = vpop.eup %607 }
 0x2be   :  { %v360_v24 = vsel %vm290_vm15, %v608_v23, 0.0 }
 0x2bf   :  { %361 = vadd.xlane.f32.xlu1 %v360_v24 }
 0x2cf   :  { %v341_v25 = vpop.xlane.xlu0 %340 }
 0x2d0   :  { %609 = vrcp.f32 %v341_v25 }
 0x2d6   :  { %v610_v26 = vpop.eup %609 }
 0x2d7   :  { %v344_v27 = vpop.xlane.xlu0 %343  ;;  %v371_v31 = vmul.f32 %v610_v26, %v925_v44 }
 0x2d8   :  { %611 = vrcp.f32 %v344_v27 }
 0x2d9   :  { %556 = vmatmul.msk.f32.vlgmr.msra.gmra.mxu2 %vm290_vm15, %v371_v31 }
 0x2de   :  { %v612_v32 = vpop.eup %611 }
 0x2df   :  { %v372_v34 = vmul.f32 %v612_v32, %v929_v48 }
 0x2e1   :  { %557 = vmatmul.msk.f32.gmra.mxu2 %vm290_vm15, %v372_v34 }
 0x2e7   :  { %v350_v38 = vpop.xlane.xlu1 %349 }
 0x2e9   :  { %v347_v35 = vpop.xlane.xlu2 %346 }
 0x2ea   :  { %613 = vrcp.f32 %v347_v35 }
 0x2eb   :  { %615 = vrcp.f32 %v350_v38 }
 0x2ef   :  { %v353_v37 = vpop.xlane.xlu1 %352 }
 0x2f0   :  { %v614_v33 = vpop.eup %613  ;;  %617 = vrcp.f32 %v353_v37 }
 0x2f1   :  { %v373_v36 = vmul.f32 %v614_v33, %v598_v56  ;;  %v616_v39 = vpop.eup %615  ;;  %v359_v44 = vpop.xlane.xlu2 %358 }
 0x2f2   :  { %v374_v40 = vmul.f32 %v616_v39, %v933_v57 }
 0x2f3   :  { %558 = vmatmul.msk.f32.gmra.mxu2 %vm290_vm15, %v373_v36 }
 0x2f6   :  { %v618_v41 = vpop.eup %617 }
 0x2f7   :  { %v375_v42 = vmul.f32 %v618_v41, %v604_v0 }
 0x2fb   :  { %559 = vmatmul.msk.f32.gmra.mxu2 %vm290_vm15, %v374_v40 }
 0x303   :  { %560 = vmatmul.msk.f32.gmra.mxu2 %vm290_vm15, %v375_v42 }
 0x328   :  { %v356_v43 = vpop.xlane.xlu0 %355 }
 0x329   :  { %619 = vrcp.f32 %v356_v43 }
 0x32a   :  { %621 = vrcp.f32 %v359_v44 }
 0x32f   :  { %v620_v45 = vpop.eup %619 }
 0x330   :  { %v376_v46 = vmul.f32 %v620_v45, %v606_v18  ;;  %v622_v48 = vpop.eup %621 }
 0x331   :  { %v377_v28 = vmul.f32 %v622_v48, %v938_v63 }
 0x332   :  { %561 = vmatmul.msk.f32.gmra.mxu2 %vm290_vm15, %v376_v46  ;;  %v362_v47 = vpop.xlane.xlu1 %361 }
 0x333   :  { %623 = vrcp.f32 %v362_v47 }
 0x339   :  { %v624_v29 = vpop.eup %623 }
 0x33a   :  { %562 = vmatmul.msk.f32.gmra.mxu2 %vm290_vm15, %v377_v28  ;;  %v378_v30 = vmul.f32 %v624_v29, %v608_v23 }
 0x342   :  { %563 = vmatmul.msk.f32.gmra.mxu2 %vm290_vm15, %v378_v30 }
 0x35c   :  { %v443_v49 = vpop.f32.mrf.mxu2 }
 0x35d   :  { %v467_v56 = vmul.f32 %v844_v60, %v443_v49 }
 0x35f   :  { %v475_v59 = vsel %vm20_vm0, %v467_v56, 0.0 }
 0x364   :  { %v446_v50 = vpop.f32.mrf.mxu2 }
 0x365   :  { %v468_v5 = vmul.f32 %v844_v60, %v446_v50 }
 0x367   :  { %v482_v11 = vsel %vm20_vm0, %v468_v5, 0.0 }
 0x376   :  { %v449_v51 = vpop.f32.mrf.mxu2 }
 0x377   :  { %v469_v55 = vmul.f32 %v864_v4, %v449_v51 }
 0x379   :  { %v476_v58 = vsel %vm20_vm0, %v469_v55, 0.0 }
 0x37a   :  { %v477_v63 = vadd.f32 %v476_v58, %v475_v59 }
 0x37e   :  { %v452_v52 = vpop.f32.mrf.mxu2 }
 0x37f   :  { %v470_v1 = vmul.f32 %v864_v4, %v452_v52 }
 0x381   :  { %v483_v10 = vsel %vm20_vm0, %v470_v1, 0.0 }
 0x382   :  { %v484_v13 = vadd.f32 %v483_v10, %v482_v11 }
 0x386   :  { %v455_v53 = vpop.f32.mrf.mxu2 }
 0x387   :  { %v471_v57 = vmul.f32 %v872_v7, %v455_v53 }
 0x389   :  { %v478_v62 = vsel %vm20_vm0, %v471_v57, 0.0 }
 0x38a   :  { %v479_v3 = vadd.f32 %v478_v62, %v477_v63 }
 0x3b5   :  { %v458_v54 = vpop.f32.mrf.mxu2 }
 0x3b6   :  { %v472_v6 = vmul.f32 %v872_v7, %v458_v54 }
 0x3b8   :  { %v485_v12 = vsel %vm20_vm0, %v472_v6, 0.0 }
 0x3b9   :  { %v486_v60 = vadd.f32 %v485_v12, %v484_v13 }
 0x3bd   :  { %v461_v0 = vpop.f32.mrf.mxu2 }
 0x3be   :  { %v473_v2 = vmul.f32 %v846_v61, %v461_v0 }
 0x3c0   :  { %v480_v8 = vsel %vm20_vm0, %v473_v2, 0.0 }
 0x3c1   :  { %v481_v9 = vadd.f32 %v480_v8, %v479_v3 }
 0x3c3   :  { %489 = vst.msk [vmem:[#allocation3] sm:$0xff] %vm20_vm0, %v481_v9 }
 0x3c5   :  { %v464_v4 = vpop.f32.mrf.mxu2 }
 0x3c6   :  { %v474_v14 = vmul.f32 %v846_v61, %v464_v4 }
 0x3c8   :  { %v487_v7 = vsel %vm20_vm0, %v474_v14, 0.0 }
 0x3c9   :  { %v488_v15 = vadd.f32 %v487_v7, %v486_v60 }
 0x3cb   :  { %490 = vst.msk [vmem:[#allocation3 + $0x8] sm:$0xff] %vm20_vm0, %v488_v15 }
 0x3cc   :  { %503 = dma.vmem_to_hbm [thread:$0]  %s496_s12, 256, %s498_s14, [#allocation4], %s681_s10, %s681_s10, %s682_s11  }
 0x3cd   :  { %673 = dma.done.wait [#allocation4], 256  }
 0x3ce   :  { %674 = vsyncadd [#allocation4], 4294967040 }
 0x3cf   :  { %675 = dma.done.wait [#allocation6], 896  }
 0x3d0   :  { %676 = vsyncadd [#allocation6], 4294966400 }
 0x3d1   :  { %525 = vsyncpa [#allocation4], 1 }
 0x3d2   :  { %526 = vsyncpa [#allocation6], 1 }

</bundles_post_ra>
